<compile_context>
chip_gen: v5e
topology: v5e:2x2
jax: 0.10.0
libtpu: 0.0.40
codegen_flags: <defaults>
</compile_context>

<pallas_src>
import functools

import jax
import jax.numpy as jnp
from jax.experimental import pallas as pl
from jax.experimental.pallas import tpu as pltpu

LANE = 128      # vreg lane width
SUBLANE = 8     # vreg sublane count


def _round_up(x, m):
    return (x + m - 1) // m * m


def anet_kernel(x_ref,
                w1_ref, b1_ref,
                w2_ref, b2_ref,
                w3_ref, b3_ref,
                w4_ref, b4_ref,
                out_ref):
    # One batch tile per grid step; weights/biases are VMEM-resident across
    # the whole grid (constant index_maps -> DMA'd once, never re-fetched).
    # x arrives unpadded (TB, S) in its HBM dtype; cast to bf16 on the VPU so
    # the HBM read stays narrow instead of a 128-wide padded stream.
    x = x_ref[...].astype(jnp.bfloat16)

    # bf16 x bf16 MXU matmuls with f32 accumulation; bias add + ReLU in f32
    # on the VPU (v5e-friendly), re-cast to bf16 between layers.
    h = jnp.dot(x, w1_ref[...], preferred_element_type=jnp.float32) + b1_ref[...]
    h = jnp.maximum(h, 0.0).astype(jnp.bfloat16)

    h = jnp.dot(h, w2_ref[...], preferred_element_type=jnp.float32) + b2_ref[...]
    h = jnp.maximum(h, 0.0).astype(jnp.bfloat16)

    h = jnp.dot(h, w3_ref[...], preferred_element_type=jnp.float32) + b3_ref[...]
    h = jnp.maximum(h, 0.0).astype(jnp.bfloat16)

    h = jnp.dot(h, w4_ref[...], preferred_element_type=jnp.float32) + b4_ref[...]
    out_ref[...] = h.astype(out_ref.dtype)      # bf16 write-back


def init_anet_params(key, state_dim, hidden_dim, embedding_dim):
    """nn.Linear-style uniform(-1/sqrt(fan_in), 1/sqrt(fan_in)) init.

    Weights are stored pre-transposed as (in_features, out_features), cast to
    bf16 once, and zero-padded to lane-dense shapes:
      * layer 1 keeps its true input dim (so the streamed x read is narrow);
      * layers 2-4 pad the input dim to 128 so zero-padded activation lanes
        can never contaminate real outputs;
      * all output dims pad to 128. Biases are f32 (1, out_pad), zero-padded.
    """
    dims = [(state_dim, hidden_dim),
            (hidden_dim, hidden_dim),
            (hidden_dim, hidden_dim),
            (hidden_dim, embedding_dim)]
    params = []
    for li, (fan_in, fan_out) in enumerate(dims):
        key, kw, kb = jax.random.split(key, 3)
        bound = 1.0 / jnp.sqrt(jnp.float32(fan_in))
        w = jax.random.uniform(kw, (fan_in, fan_out), jnp.float32, -bound, bound)
        b = jax.random.uniform(kb, (fan_out,), jnp.float32, -bound, bound)
        fi_p = fan_in if li == 0 else _round_up(fan_in, LANE)
        fo_p = _round_up(fan_out, LANE)
        w_p = jnp.zeros((fi_p, fo_p), jnp.bfloat16).at[:fan_in, :fan_out].set(
            w.astype(jnp.bfloat16))
        b_p = jnp.zeros((1, fo_p), jnp.float32).at[0, :fan_out].set(b)
        params.extend([w_p, b_p])
    return params


def _choose_batch_tile(B, block_b):
    """Batch tile that (a) keeps B_pad/B near 1 and (b) yields >=2 grid steps
    when possible so the parallel batch axis shards across both v7x cores."""
    n_steps = pl.cdiv(B, block_b)
    tb = _round_up(pl.cdiv(B, n_steps), SUBLANE)
    if pl.cdiv(B, tb) < 2 and tb > SUBLANE:
        tb = _round_up(pl.cdiv(tb, 2), SUBLANE)
    return tb, _round_up(B, tb)


@functools.partial(jax.jit, static_argnames=("embedding_dim", "block_b"))
def anet_forward(x, w1, b1, w2, b2, w3, b3, w4, b4, *,
                 embedding_dim, block_b=1024):
    B, S = x.shape
    E_pad = w4.shape[1]

    TB, B_pad = _choose_batch_tile(B, block_b)
    if B_pad != B:
        x_in = jnp.zeros((B_pad, S), x.dtype).at[:B].set(x)
    else:
        x_in = x                                  # no wrapper-side copy

    def resident(arr):
        # Full-array block, constant index -> stays in VMEM, no re-DMA.
        return pl.BlockSpec(arr.shape, lambda i: (0, 0))

    out = pl.pallas_call(
        anet_kernel,
        out_shape=jax.ShapeDtypeStruct((B_pad, E_pad), jnp.bfloat16),
        grid=(B_pad // TB,),
        in_specs=[
            # x: tiled over batch; last dim == full array dim (unpadded S).
            pl.BlockSpec((TB, S), lambda i: (i, 0)),
            resident(w1), resident(b1),
            resident(w2), resident(b2),
            resident(w3), resident(b3),
            resident(w4), resident(b4),
        ],
        out_specs=pl.BlockSpec((TB, E_pad), lambda i: (i, 0)),
        compiler_params=pltpu.CompilerParams(
            dimension_semantics=("parallel",)),
    )(x_in, w1, b1, w2, b2, w3, b3, w4, b4)

    return out[:B, :embedding_dim].astype(jnp.float32)


def anet_ref(x, params, embedding_dim):
    """Pure-JAX reference with the same bf16-weight / f32-accum math."""
    w1, b1, w2, b2, w3, b3, w4, b4 = params
    h = x.astype(jnp.bfloat16)
    for (w, b, act) in ((w1, b1, True), (w2, b2, True),
                        (w3, b3, True), (w4, b4, False)):
        h = jnp.dot(h, w, preferred_element_type=jnp.float32) + b
        if act:
            h = jnp.maximum(h, 0.0).astype(jnp.bfloat16)
    return h.astype(jnp.bfloat16)[:, :embedding_dim].astype(jnp.float32)


if __name__ == "__main__":
    state_dim, hidden_dim, embedding_dim = 16, 32, 8
    batch = 4

    key = jax.random.PRNGKey(0)
    key, kx = jax.random.split(key)
    x = jax.random.normal(kx, (batch, state_dim), jnp.float32)

    params = init_anet_params(key, state_dim, hidden_dim, embedding_dim)

    out = anet_forward(x, *params, embedding_dim=embedding_dim)
    out = jax.block_until_ready(out)

    expected = anet_ref(x, params, embedding_dim)
    assert out.shape == (batch, embedding_dim)
    assert jnp.allclose(out, expected, atol=1e-2, rtol=1e-2), (
        "max abs err %.3e" % float(jnp.max(jnp.abs(out - expected))))

    print("KERNEL_OK")
</pallas_src>

<mosaic_0001>
module attributes {stable_mosaic.version = 11 : i64} {
  func.func @anet_kernel(%arg0: i32, %arg1: memref<8x16xf32, #tpu.memory_space<vmem>>, %arg2: memref<16x128xbf16, #tpu.memory_space<vmem>>, %arg3: memref<1x128xf32, #tpu.memory_space<vmem>>, %arg4: memref<128x128xbf16, #tpu.memory_space<vmem>>, %arg5: memref<1x128xf32, #tpu.memory_space<vmem>>, %arg6: memref<128x128xbf16, #tpu.memory_space<vmem>>, %arg7: memref<1x128xf32, #tpu.memory_space<vmem>>, %arg8: memref<128x128xbf16, #tpu.memory_space<vmem>>, %arg9: memref<1x128xf32, #tpu.memory_space<vmem>>, %arg10: memref<8x128xbf16, #tpu.memory_space<vmem>>) attributes {dimension_semantics = [#tpu.dimension_semantics<parallel>], iteration_bounds = array<i64: 1>, scalar_prefetch = 0 : i64, scratch_operands = 0 : i64, tpu.core_type = #tpu.core_type<tc>, window_params = [{transform_indices = @transform_0, window_bounds = array<i64: 8, 16>}, {pipeline_mode = #tpu.pipeline_mode<synchronous>, transform_indices = @transform_1, window_bounds = array<i64: 16, 128>}, {pipeline_mode = #tpu.pipeline_mode<synchronous>, transform_indices = @transform_2, window_bounds = array<i64: 1, 128>}, {pipeline_mode = #tpu.pipeline_mode<synchronous>, transform_indices = @transform_3, window_bounds = array<i64: 128, 128>}, {pipeline_mode = #tpu.pipeline_mode<synchronous>, transform_indices = @transform_4, window_bounds = array<i64: 1, 128>}, {pipeline_mode = #tpu.pipeline_mode<synchronous>, transform_indices = @transform_5, window_bounds = array<i64: 128, 128>}, {pipeline_mode = #tpu.pipeline_mode<synchronous>, transform_indices = @transform_6, window_bounds = array<i64: 1, 128>}, {pipeline_mode = #tpu.pipeline_mode<synchronous>, transform_indices = @transform_7, window_bounds = array<i64: 128, 128>}, {pipeline_mode = #tpu.pipeline_mode<synchronous>, transform_indices = @transform_8, window_bounds = array<i64: 1, 128>}, {transform_indices = @transform_9, window_bounds = array<i64: 8, 128>}]} {
    %c0 = arith.constant 0 : index
    %c0_0 = arith.constant 0 : index
    %0 = vector.load %arg1[%c0, %c0_0] : memref<8x16xf32, #tpu.memory_space<vmem>>, vector<8x16xf32>
    %1 = arith.truncf %0 : vector<8x16xf32> to vector<8x16xbf16>
    %c0_1 = arith.constant 0 : index
    %c0_2 = arith.constant 0 : index
    %2 = vector.load %arg2[%c0_1, %c0_2] : memref<16x128xbf16, #tpu.memory_space<vmem>>, vector<16x128xbf16>
    %cst = arith.constant dense<0.000000e+00> : vector<8x128xf32>
    %3 = tpu.matmul %1, %2, %cst {dimension_numbers = #tpu.dot_dimension_numbers<[1], [0], [0], [1], [0, 0, 1, 1], [], []>} : vector<8x16xbf16>, vector<16x128xbf16>, vector<8x128xf32> -> vector<8x128xf32>
    %c0_3 = arith.constant 0 : index
    %c0_4 = arith.constant 0 : index
    %4 = vector.load %arg3[%c0_3, %c0_4] : memref<1x128xf32, #tpu.memory_space<vmem>>, vector<1x128xf32>
    %5 = vector.broadcast %4 : vector<1x128xf32> to vector<8x128xf32>
    %6 = arith.addf %3, %5 : vector<8x128xf32>
    %cst_5 = arith.constant 0.000000e+00 : f32
    %7 = vector.broadcast %cst_5 : f32 to vector<8x128xf32>
    %8 = arith.maximumf %6, %7 : vector<8x128xf32>
    %9 = arith.truncf %8 : vector<8x128xf32> to vector<8x128xbf16>
    %c0_6 = arith.constant 0 : index
    %c0_7 = arith.constant 0 : index
    %10 = vector.load %arg4[%c0_6, %c0_7] : memref<128x128xbf16, #tpu.memory_space<vmem>>, vector<128x128xbf16>
    %cst_8 = arith.constant dense<0.000000e+00> : vector<8x128xf32>
    %11 = tpu.matmul %9, %10, %cst_8 {dimension_numbers = #tpu.dot_dimension_numbers<[1], [0], [0], [1], [0, 0, 1, 1], [], []>} : vector<8x128xbf16>, vector<128x128xbf16>, vector<8x128xf32> -> vector<8x128xf32>
    %c0_9 = arith.constant 0 : index
    %c0_10 = arith.constant 0 : index
    %12 = vector.load %arg5[%c0_9, %c0_10] : memref<1x128xf32, #tpu.memory_space<vmem>>, vector<1x128xf32>
    %13 = vector.broadcast %12 : vector<1x128xf32> to vector<8x128xf32>
    %14 = arith.addf %11, %13 : vector<8x128xf32>
    %cst_11 = arith.constant 0.000000e+00 : f32
    %15 = vector.broadcast %cst_11 : f32 to vector<8x128xf32>
    %16 = arith.maximumf %14, %15 : vector<8x128xf32>
    %17 = arith.truncf %16 : vector<8x128xf32> to vector<8x128xbf16>
    %c0_12 = arith.constant 0 : index
    %c0_13 = arith.constant 0 : index
    %18 = vector.load %arg6[%c0_12, %c0_13] : memref<128x128xbf16, #tpu.memory_space<vmem>>, vector<128x128xbf16>
    %cst_14 = arith.constant dense<0.000000e+00> : vector<8x128xf32>
    %19 = tpu.matmul %17, %18, %cst_14 {dimension_numbers = #tpu.dot_dimension_numbers<[1], [0], [0], [1], [0, 0, 1, 1], [], []>} : vector<8x128xbf16>, vector<128x128xbf16>, vector<8x128xf32> -> vector<8x128xf32>
    %c0_15 = arith.constant 0 : index
    %c0_16 = arith.constant 0 : index
    %20 = vector.load %arg7[%c0_15, %c0_16] : memref<1x128xf32, #tpu.memory_space<vmem>>, vector<1x128xf32>
    %21 = vector.broadcast %20 : vector<1x128xf32> to vector<8x128xf32>
    %22 = arith.addf %19, %21 : vector<8x128xf32>
    %cst_17 = arith.constant 0.000000e+00 : f32
    %23 = vector.broadcast %cst_17 : f32 to vector<8x128xf32>
    %24 = arith.maximumf %22, %23 : vector<8x128xf32>
    %25 = arith.truncf %24 : vector<8x128xf32> to vector<8x128xbf16>
    %c0_18 = arith.constant 0 : index
    %c0_19 = arith.constant 0 : index
    %26 = vector.load %arg8[%c0_18, %c0_19] : memref<128x128xbf16, #tpu.memory_space<vmem>>, vector<128x128xbf16>
    %cst_20 = arith.constant dense<0.000000e+00> : vector<8x128xf32>
    %27 = tpu.matmul %25, %26, %cst_20 {dimension_numbers = #tpu.dot_dimension_numbers<[1], [0], [0], [1], [0, 0, 1, 1], [], []>} : vector<8x128xbf16>, vector<128x128xbf16>, vector<8x128xf32> -> vector<8x128xf32>
    %c0_21 = arith.constant 0 : index
    %c0_22 = arith.constant 0 : index
    %28 = vector.load %arg9[%c0_21, %c0_22] : memref<1x128xf32, #tpu.memory_space<vmem>>, vector<1x128xf32>
    %29 = vector.broadcast %28 : vector<1x128xf32> to vector<8x128xf32>
    %30 = arith.addf %27, %29 : vector<8x128xf32>
    %31 = arith.truncf %30 : vector<8x128xf32> to vector<8x128xbf16>
    %c0_23 = arith.constant 0 : index
    %c0_24 = arith.constant 0 : index
    %32 = vector.load %arg10[%c0_23, %c0_24] : memref<8x128xbf16, #tpu.memory_space<vmem>>, vector<8x128xbf16>
    tpu.vector_store %arg10[%c0_23, %c0_24], %31 {strides = array<i32>} : memref<8x128xbf16, #tpu.memory_space<vmem>>, vector<8x128xbf16>,
    return
  }
  func.func @transform_0(%arg0: i32) -> (i32, i32) {
    %c0_i32 = arith.constant 0 : i32
    %c0_i32_0 = arith.constant 0 : i32
    return %arg0, %c0_i32 : i32, i32
  }
  func.func @transform_1(%arg0: i32) -> (i32, i32) {
    %c0_i32 = arith.constant 0 : i32
    %c0_i32_0 = arith.constant 0 : i32
    %c0_i32_1 = arith.constant 0 : i32
    return %c0_i32, %c0_i32_0 : i32, i32
  }
  func.func @transform_2(%arg0: i32) -> (i32, i32) {
    %c0_i32 = arith.constant 0 : i32
    %c0_i32_0 = arith.constant 0 : i32
    %c0_i32_1 = arith.constant 0 : i32
    return %c0_i32, %c0_i32_0 : i32, i32
  }
  func.func @transform_3(%arg0: i32) -> (i32, i32) {
    %c0_i32 = arith.constant 0 : i32
    %c0_i32_0 = arith.constant 0 : i32
    %c0_i32_1 = arith.constant 0 : i32
    return %c0_i32, %c0_i32_0 : i32, i32
  }
  func.func @transform_4(%arg0: i32) -> (i32, i32) {
    %c0_i32 = arith.constant 0 : i32
    %c0_i32_0 = arith.constant 0 : i32
    %c0_i32_1 = arith.constant 0 : i32
    return %c0_i32, %c0_i32_0 : i32, i32
  }
  func.func @transform_5(%arg0: i32) -> (i32, i32) {
    %c0_i32 = arith.constant 0 : i32
    %c0_i32_0 = arith.constant 0 : i32
    %c0_i32_1 = arith.constant 0 : i32
    return %c0_i32, %c0_i32_0 : i32, i32
  }
  func.func @transform_6(%arg0: i32) -> (i32, i32) {
    %c0_i32 = arith.constant 0 : i32
    %c0_i32_0 = arith.constant 0 : i32
    %c0_i32_1 = arith.constant 0 : i32
    return %c0_i32, %c0_i32_0 : i32, i32
  }
  func.func @transform_7(%arg0: i32) -> (i32, i32) {
    %c0_i32 = arith.constant 0 : i32
    %c0_i32_0 = arith.constant 0 : i32
    %c0_i32_1 = arith.constant 0 : i32
    return %c0_i32, %c0_i32_0 : i32, i32
  }
  func.func @transform_8(%arg0: i32) -> (i32, i32) {
    %c0_i32 = arith.constant 0 : i32
    %c0_i32_0 = arith.constant 0 : i32
    %c0_i32_1 = arith.constant 0 : i32
    return %c0_i32, %c0_i32_0 : i32, i32
  }
  func.func @transform_9(%arg0: i32) -> (i32, i32) {
    %c0_i32 = arith.constant 0 : i32
    %c0_i32_0 = arith.constant 0 : i32
    return %arg0, %c0_i32 : i32, i32
  }
}

</mosaic_0001>

<bundles_post_ra>
// kernel: anet_forward.1
= control target key start
LH: loop header
LB: loop body
LE: loop exit
PB: predicated region body
PF: predicated region fallthrough
CT: control target
= control target key end

     0   :  { %14 = vsyncpa [#allocation3], 0  ;;  %s664_s0 = inlined_call_operand.vmem [shape: f32[8,16], index: 0, kind: input, shape index: {}]   ;;  %s665_s1 = inlined_call_operand.vmem [shape: bf16[16,128], index: 1, kind: input, shape index: {}]   ;;  %s666_s2 = inlined_call_operand.vmem [shape: f32[1,128], index: 2, kind: input, shape index: {}]   ;;  %s667_s3 = inlined_call_operand.hbm [shape: bf16[128,128], index: 3, kind: input, shape index: {}]   ;;  %s668_s4 = inlined_call_operand.vmem [shape: f32[1,128], index: 4, kind: input, shape index: {}]   ;;  %s669_s5 = inlined_call_operand.hbm [shape: bf16[128,128], index: 5, kind: input, shape index: {}]   ;;  %s670_s6 = inlined_call_operand.vmem [shape: f32[1,128], index: 6, kind: input, shape index: {}]   ;;  %s671_s7 = inlined_call_operand.hbm [shape: bf16[128,128], index: 7, kind: input, shape index: {}]   ;;  %s672_s8 = inlined_call_operand.vmem [shape: f32[1,128], index: 8, kind: input, shape index: {}]   ;;  %s673_s9 = inlined_call_operand.vmem [shape: bf16[8,128], index: 9, kind: output, shape index: {}]  }
   0x1   :  { %15 = vsyncpa [#allocation5], 0  ;;  %s41_s11 = sshll.u32 %s669_s5, 4  ;;  %s579_s12 = smov [#allocation4]   ;;  %s42_s11 = int_to_ptr.hbm [resolvable:$true] %s41_s11 }
   0x2   :  { %s43_s13 = sshll.u32 %s579_s12, 4  ;;  %s26_s16 = sshll.u32 %s667_s3, 4  ;;  %s44_s13 = int_to_ptr.vmem [resolvable:$true] %s43_s13  ;;  %s27_s16 = int_to_ptr.hbm [resolvable:$true] %s26_s16 }
   0x3   :  { %s580_s17 = smov 64   ;;  %s581_s18 = smov 4  }
   0x4   :  { %49 = dma.hbm_to_vmem [thread:$0]  %s42_s11, 1024, %s44_s13, [#allocation5], %s580_s17, %s580_s17, %s581_s18  }
   0x5   :  { %s582_s19 = smov [#allocation2]   ;;  %s56_s23 = sshll.u32 %s671_s7, 4  ;;  %s57_s23 = int_to_ptr.hbm [resolvable:$true] %s56_s23 }
   0x6   :  { %s28_s20 = sshll.u32 %s582_s19, 4  ;;  %s583_s5 = smov [#allocation6]   ;;  %s29_s20 = int_to_ptr.vmem [resolvable:$true] %s28_s20 }
   0x7   :  { %34 = dma.hbm_to_vmem [thread:$0]  %s27_s16, 1024, %s29_s20, [#allocation3], %s580_s17, %s580_s17, %s581_s18  }
   0x8   :  { %s58_s24 = sshll.u32 %s583_s5, 4  ;;  %s59_s24 = int_to_ptr.vmem [resolvable:$true] %s58_s24 }
   0x9   :  { %64 = dma.hbm_to_vmem [thread:$0]  %s57_s23, 1024, %s59_s24, [#allocation5], %s580_s17, %s580_s17, %s581_s18  }
   0xa   :  { %575 = dma.done.wait [#allocation3], 1024  }
   0xb   :  { %576 = vsyncadd [#allocation3], 4294966272 }
   0xc   :  { %577 = dma.done.wait [#allocation5], 2048  }
   0xd   :  { %578 = vsyncadd [#allocation5], 4294965248  ;;  %v469_v0 = vld [vmem:[%s665_s1] sm:$0xff]  ;;  %v477_v2 = vld [vmem:[#allocation2 + $0x38] sm:$0xff]  ;;  %vm94_vm0 = vcmask 130048  }
   0xe   :  { %v80_v1 = vld [vmem:[%s664_s0] sm:$0xff]  ;;  %105 = vmatpush.bf16.msra.mxu0 %v469_v0  ;;  %181 = vmatpush.bf16.msra.mxu1 %v477_v2  ;;  %v476_v4 = vld [vmem:[#allocation2 + $0x30] sm:$0xff]  ;;  %v475_v5 = vld [vmem:[#allocation2 + $0x28] sm:$0xff] }
   0xf   :  { %v81_v3 = vpack.c.bf16 %v80_v1, %v80_v1  ;;  %v474_v6 = vld [vmem:[#allocation2 + $0x20] sm:$0xff]  ;;  %v473_v7 = vld [vmem:[#allocation2 + $0x18] sm:$0xff]  ;;  %v472_v8 = vld [vmem:[#allocation2 + $0x10] sm:$0xff] }
  0x10   :  { %v471_v9 = vld [vmem:[#allocation2 + $0x8] sm:$0xff]  ;;  %v470_v10 = vld [vmem:[#allocation2] sm:$0xff]  ;;  %v485_v11 = vld [vmem:[#allocation4 + $0x38] sm:$0xff] }
  0x11   :  { %372 = vmatmul.msk.bf16.vlgmr.msra.gmra.mxu0 %vm94_vm0, %v81_v3  ;;  %264 = vmatpush.bf16.msra.mxu2 %v485_v11  ;;  %v484_v12 = vld [vmem:[#allocation4 + $0x30] sm:$0xff]  ;;  %v483_v13 = vld [vmem:[#allocation4 + $0x28] sm:$0xff]  ;;  %v482_v14 = vld [vmem:[#allocation4 + $0x20] sm:$0xff] }
  0x12   :  { %182 = vmatpush.bf16.msra.mxu1 %v476_v4  ;;  %v481_v15 = vld [vmem:[#allocation4 + $0x18] sm:$0xff]  ;;  %v480_v16 = vld [vmem:[#allocation4 + $0x10] sm:$0xff]  ;;  %v499_v17 = vld [vmem:[%s666_s2] ss:$0 sm:$0xff] }
  0x13   :  { %v479_v23 = vld [vmem:[#allocation4 + $0x8] sm:$0xff]  ;;  %v478_v24 = vld [vmem:[#allocation4] sm:$0xff]  ;;  %v493_v25 = vld [vmem:[#allocation6 + $0x38] sm:$0xff] }
  0x14   :  { %347 = vmatpush.bf16.msra.mxu3 %v493_v25  ;;  %v492_v26 = vld [vmem:[#allocation6 + $0x30] sm:$0xff]  ;;  %v491_v27 = vld [vmem:[#allocation6 + $0x28] sm:$0xff]  ;;  %v490_v28 = vld [vmem:[#allocation6 + $0x20] sm:$0xff] }
  0x15   :  { %265 = vmatpush.bf16.msra.mxu2 %v484_v12  ;;  %v489_v29 = vld [vmem:[#allocation6 + $0x18] sm:$0xff]  ;;  %v488_v30 = vld [vmem:[#allocation6 + $0x10] sm:$0xff]  ;;  %v500_v31 = vld [vmem:[%s668_s4] ss:$0 sm:$0xff] }
  0x16   :  { %183 = vmatpush.bf16.msra.mxu1 %v475_v5  ;;  %v487_v37 = vld [vmem:[#allocation6 + $0x8] sm:$0xff]  ;;  %v486_v38 = vld [vmem:[#allocation6] sm:$0xff] }
  0x17   :  { %v501_v39 = vld [vmem:[%s670_s6] ss:$0 sm:$0xff] }
  0x18   :  { %348 = vmatpush.bf16.msra.mxu3 %v492_v26  ;;  %v502_v45 = vld [vmem:[%s672_s8] ss:$0 sm:$0xff] }
  0x19   :  { %266 = vmatpush.bf16.msra.mxu2 %v483_v13 }
  0x1a   :  { %184 = vmatpush.bf16.msra.mxu1 %v474_v6 }
  0x1c   :  { %349 = vmatpush.bf16.msra.mxu3 %v491_v27 }
  0x1d   :  { %267 = vmatpush.bf16.msra.mxu2 %v482_v14 }
  0x1e   :  { %185 = vmatpush.bf16.msra.mxu1 %v473_v7 }
  0x20   :  { %350 = vmatpush.bf16.msra.mxu3 %v490_v28 }
  0x21   :  { %268 = vmatpush.bf16.msra.mxu2 %v481_v15 }
  0x22   :  { %186 = vmatpush.bf16.msra.mxu1 %v472_v8 }
  0x24   :  { %351 = vmatpush.bf16.msra.mxu3 %v489_v29 }
  0x25   :  { %269 = vmatpush.bf16.msra.mxu2 %v480_v16 }
  0x26   :  { %187 = vmatpush.bf16.msra.mxu1 %v471_v9 }
  0x28   :  { %352 = vmatpush.bf16.msra.mxu3 %v488_v30 }
  0x29   :  { %270 = vmatpush.bf16.msra.mxu2 %v479_v23 }
  0x2a   :  { %188 = vmatpush.bf16.msra.mxu1 %v470_v10 }
  0x2c   :  { %353 = vmatpush.bf16.msra.mxu3 %v487_v37 }
  0x2d   :  { %271 = vmatpush.bf16.msra.mxu2 %v478_v24 }
  0x30   :  { %354 = vmatpush.bf16.msra.mxu3 %v486_v38 }
  0x8e   :  { %v107_v18 = vpop.f32.mrf.mxu0 }
  0x8f   :  { %v108_v19 = vadd.f32 %v499_v17, %v107_v18 }
  0x91   :  { %v111_v20 = vmax.f32 %v108_v19, 0.0 }
  0x93   :  { %v112_v21 = vpack.c.bf16 %v111_v20, %v111_v20 }
  0x95   :  { %189 = vmatmul.bf16.vlgmr.msra.gmra.mxu1 %v112_v21 }
  0x96   :  { %v109_v22 = vpop.f32.mrf.mxu0 }
 0x112   :  { %v190_v32 = vpop.f32.mrf.mxu1 }
 0x113   :  { %v191_v33 = vadd.f32 %v500_v31, %v190_v32 }
 0x115   :  { %v194_v34 = vmax.f32 %v191_v33, 0.0 }
 0x117   :  { %v195_v35 = vpack.c.bf16 %v194_v34, %v194_v34 }
 0x119   :  { %272 = vmatmul.bf16.vlgmr.msra.gmra.mxu2 %v195_v35 }
 0x11a   :  { %v192_v36 = vpop.f32.mrf.mxu1 }
 0x19c   :  { %v273_v40 = vpop.f32.mrf.mxu2 }
 0x19d   :  { %v274_v41 = vadd.f32 %v501_v39, %v273_v40 }
 0x19f   :  { %v277_v42 = vmax.f32 %v274_v41, 0.0 }
 0x1a1   :  { %v278_v43 = vpack.c.bf16 %v277_v42, %v277_v42 }
 0x1a3   :  { %355 = vmatmul.bf16.vlgmr.msra.gmra.mxu3 %v278_v43 }
 0x1a4   :  { %v275_v44 = vpop.f32.mrf.mxu2 }
 0x226   :  { %v356_v46 = vpop.f32.mrf.mxu3 }
 0x227   :  { %v357_v47 = vadd.f32 %v502_v45, %v356_v46 }
 0x229   :  { %v360_v48 = vpack.c.bf16 %v357_v47, %v357_v47 }
 0x22b   :  { %361 = vst [vmem:[%s673_s9] sm:$0xf] %v360_v48 }
 0x22e   :  { %v358_v49 = vpop.f32.mrf.mxu3 }
 0x22f   :  { %366 = vsyncpa [#allocation3], 1 }
 0x230   :  { %367 = vsyncpa [#allocation5], 1 }

</bundles_post_ra>
